<compile_context>
chip_gen: v5e
topology: v5e:2x2
jax: 0.10.0
libtpu: 0.0.40
codegen_flags: <defaults>
</compile_context>

<pallas_src>
import functools

import jax
import jax.numpy as jnp
import numpy as np
from jax import lax
from jax.experimental import pallas as pl
from jax.experimental.pallas import tpu as pltpu


def _round_up(x, m):
    return (x + m - 1) // m * m


def _vmem_limit_bytes():
    """~3/4 of per-core VMEM: 96 MiB on v5e/v6e (128 MiB), 48 MiB on v7x (64 MiB)."""
    cap = 128 * 1024 * 1024
    try:
        info_fn = getattr(pltpu, "get_tpu_info", None)
        if info_fn is not None:
            cap = int(getattr(info_fn(), "vmem_capacity_bytes", cap)) or cap
    except Exception:
        pass
    return (3 * cap) // 4


def _conv_in_lrelu_kernel(x_ref, w_ref, g_ref, b_ref, o_ref, col_ref, *,
                          KH, KW, Wp, M, Cin_pad, out_w,
                          inv_count, eps, neg_slope, build_once):
    """One (batch, channel-tile) grid step.

    x_ref   : (Cin_pad, L)           bf16  zero-padded, flattened input
    w_ref   : (CT, KH*KW*Cin_pad)    bf16  tap-stacked conv weights
    g_ref   : (CT, 1)                f32   InstanceNorm gamma
    b_ref   : (CT, 1)                f32   InstanceNorm beta
    o_ref   : (CT, M)                f32   wide conv+IN+LeakyReLU output
    col_ref : (KH*KW*Cin_pad, M)     bf16  tap-stacked im2col scratch
    """

    def build_im2col():
        for kh in range(KH):
            for kw in range(KW):
                t = kh * KW + kw
                off = kh * Wp + kw          # static lane offset of this tap's window
                col_ref[t * Cin_pad:(t + 1) * Cin_pad, :] = x_ref[:, off:off + M]

    if build_once:
        # Channel-tile axis is sequential ("arbitrary"): the scratch built at the
        # first channel tile of this batch element is reused by all later tiles.
        pl.when(pl.program_id(1) == 0)(build_im2col)
    else:
        # Channel-tile axis is "parallel" (may not start at 0 on a core): rebuild.
        build_im2col()

    # Single deep-contraction matmul on the MXU: (CT, 9*Cin) x (9*Cin, M),
    # bf16 operands, f32 accumulation. No VMEM accumulator, no per-tap adds.
    y = jnp.dot(w_ref[...], col_ref[...], preferred_element_type=jnp.float32)

    # Validity mask of the wide columns, generated in-kernel (no HBM operand):
    # wide column j is a real output position iff (j mod Wp) < out_w.
    # The f32 floor trick avoids vector integer div/mod; exact for M << 2^22.
    jf = lax.broadcasted_iota(jnp.int32, (1, M), 1).astype(jnp.float32)
    row = jnp.floor((jf + 0.5) * (1.0 / Wp))
    col_in_row = jf - row * Wp
    mask = (col_in_row < (out_w - 0.5)).astype(jnp.float32)         # (1, M)

    # InstanceNorm: one-pass masked sum / sum-of-squares, all stats in f32.
    ym = y * mask
    s1 = jnp.sum(ym, axis=1, keepdims=True)                         # (CT, 1)
    s2 = jnp.sum(ym * y, axis=1, keepdims=True)                     # (CT, 1)
    mean = s1 * inv_count
    var = jnp.maximum(s2 * inv_count - mean * mean, 0.0)            # biased variance
    z = (y - mean) * lax.rsqrt(var + eps) * g_ref[...] + b_ref[...]

    # LeakyReLU.
    o_ref[...] = jnp.where(z >= 0, z, neg_slope * z).astype(o_ref.dtype)


def conv_dropout_norm_relu(x_nchw, weight_oihw, gamma, beta,
                           *, eps=1e-5, neg_slope=0.01):
    """Forward pass matching the PyTorch module (stride=1, odd kernel, SAME pad).

    x_nchw      : (N, Cin, H, W)      float32
    weight_oihw : (Cout, Cin, KH, KW) float32  (PyTorch conv weight layout)
    gamma, beta : (Cout,)             float32  (InstanceNorm affine params)
    returns     : (N, Cout, H, W)     float32
    """
    N, Cin, H, W = x_nchw.shape
    Cout, Cin_w, KH, KW = weight_oihw.shape
    assert Cin_w == Cin
    assert KH % 2 == 1 and KW % 2 == 1, "odd kernels only (nnU-Net default)"
    ph, pw = (KH - 1) // 2, (KW - 1) // 2
    Hp, Wp = H + KH - 1, W + KW - 1
    M = H * Wp                       # "wide" flattened output length (cropped later)
    L = (Hp + 1) * Wp                # +1 zero row keeps the last tap window in bounds

    Cin_pad = _round_up(Cin, 8)      # sublane-align the per-tap row blocks
    Kdim = KH * KW * Cin_pad

    # Channel tiling: per-(n,c) stats are independent, so Cout tiles freely.
    if Cout <= 128:
        Cout_pad = _round_up(Cout, 8)
    else:
        Cout_pad = _round_up(Cout, 128)
    CT = min(Cout_pad, 128)
    n_ct = Cout_pad // CT

    # v7x has two TensorCores engaged only through "parallel" grid axes. If the
    # batch axis alone cannot supply >=2 parallel blocks, make the channel-tile
    # axis parallel too (splitting it if needed); the im2col scratch must then be
    # rebuilt every step because a core may not start at channel tile 0.
    parallel_c = False
    if N < 2:
        if n_ct == 1 and Cout_pad % 16 == 0:
            CT = Cout_pad // 2
            n_ct = 2
        if n_ct > 1:
            parallel_c = True
    build_once = not parallel_c

    f32, bf16 = jnp.float32, jnp.bfloat16

    # bf16 input: halves the HBM->VMEM DMA bytes; MXU is bf16-native everywhere.
    # Zero-pad channels to Cin_pad and spatially (one extra bottom row), flatten.
    x_pad = jnp.pad(x_nchw.astype(bf16),
                    ((0, 0), (0, Cin_pad - Cin), (ph, ph + 1), (pw, pw)))
    x_flat = x_pad.reshape(N, Cin_pad, L)

    # Tap-stacked weights: w_flat[o, (kh*KW+kw)*Cin_pad + c] = weight[o, c, kh, kw].
    w = jnp.transpose(weight_oihw, (0, 2, 3, 1))                    # (O, KH, KW, I)
    w = jnp.pad(w, ((0, Cout_pad - Cout), (0, 0), (0, 0), (0, Cin_pad - Cin)))
    w = w.reshape(Cout_pad, Kdim).astype(bf16)

    # Padded output channels keep gamma/beta = 0 so they stay exactly 0 (cropped).
    g = jnp.pad(gamma.astype(f32), (0, Cout_pad - Cout)).reshape(Cout_pad, 1)
    b = jnp.pad(beta.astype(f32), (0, Cout_pad - Cout)).reshape(Cout_pad, 1)

    kernel = functools.partial(
        _conv_in_lrelu_kernel,
        KH=KH, KW=KW, Wp=Wp, M=M, Cin_pad=Cin_pad, out_w=W,
        inv_count=1.0 / float(H * W), eps=float(eps),
        neg_slope=float(neg_slope), build_once=build_once)

    out_wide = pl.pallas_call(
        kernel,
        out_shape=jax.ShapeDtypeStruct((N, Cout_pad, M), f32),
        grid_spec=pltpu.PrefetchScalarGridSpec(
            num_scalar_prefetch=0,
            # Channel tiles are the innermost (fastest) axis: the x block's
            # index_map depends only on n, so the multi-MB input block stays
            # resident in VMEM across all channel tiles of a batch element.
            grid=(N, n_ct),
            in_specs=[
                pl.BlockSpec((None, Cin_pad, L), lambda n, c: (n, 0, 0)),
                pl.BlockSpec((CT, Kdim), lambda n, c: (c, 0)),
                pl.BlockSpec((CT, 1), lambda n, c: (c, 0)),
                pl.BlockSpec((CT, 1), lambda n, c: (c, 0)),
            ],
            out_specs=pl.BlockSpec((None, CT, M), lambda n, c: (n, c, 0)),
            scratch_shapes=[pltpu.VMEM((Kdim, M), bf16)],
        ),
        compiler_params=pltpu.CompilerParams(
            dimension_semantics=("parallel",
                                 "parallel" if parallel_c else "arbitrary"),
            vmem_limit_bytes=_vmem_limit_bytes()),
    )(x_flat, w, g, b)

    # Crop the wide columns and padded channels -> NCHW output (no transposes).
    return out_wide.reshape(N, Cout_pad, H, Wp)[:, :Cout, :, :W]


def _reference(x_nchw, weight_oihw, gamma, beta, eps=1e-5, neg_slope=0.01,
               *, matmul_dtype=jnp.float32):
    """Pure-JAX reference. matmul_dtype=bf16 mirrors the kernel's MXU operand cast."""
    y = lax.conv_general_dilated(
        x_nchw.astype(matmul_dtype), weight_oihw.astype(matmul_dtype),
        window_strides=(1, 1), padding="SAME",
        dimension_numbers=("NCHW", "OIHW", "NCHW"),
        preferred_element_type=jnp.float32)
    mean = jnp.mean(y, axis=(2, 3), keepdims=True)
    var = jnp.mean((y - mean) ** 2, axis=(2, 3), keepdims=True)
    yn = (y - mean) * lax.rsqrt(var + eps)
    yn = yn * gamma.reshape(1, -1, 1, 1) + beta.reshape(1, -1, 1, 1)
    return jnp.where(yn >= 0, yn, neg_slope * yn)


if __name__ == "__main__":
    # ConvDropoutNormReLU(nn.Conv2d, 4, 8, kernel_size=3, stride=1,
    #                     norm_op=nn.InstanceNorm2d, norm_op_kwargs={'affine': True},
    #                     nonlin=nn.LeakyReLU)
    N, Cin, Cout, H, W, K = 2, 4, 8, 16, 16, 3
    key = jax.random.PRNGKey(0)
    kx, kw_, kg, kb = jax.random.split(key, 4)

    x = jax.random.normal(kx, (N, Cin, H, W), dtype=jnp.float32)
    weight = jax.random.normal(kw_, (Cout, Cin, K, K), dtype=jnp.float32) * 0.1
    gamma = 1.0 + 0.1 * jax.random.normal(kg, (Cout,), dtype=jnp.float32)
    beta = 0.1 * jax.random.normal(kb, (Cout,), dtype=jnp.float32)

    out = conv_dropout_norm_relu(x, weight, gamma, beta)
    out = jax.block_until_ready(out)

    # Tight check against a reference that mirrors the kernel's bf16 conv operands
    # (f32 accumulation / stats) — validates the fused conv+IN+LeakyReLU math.
    ref_bf16 = _reference(x, weight, gamma, beta, matmul_dtype=jnp.bfloat16)
    np.testing.assert_allclose(np.asarray(out), np.asarray(ref_bf16),
                               rtol=2e-3, atol=2e-3)
    # Loose check against the full-f32 module semantics; the residual is just the
    # bf16 quantization of the conv operands.
    ref_f32 = _reference(x, weight, gamma, beta)
    np.testing.assert_allclose(np.asarray(out), np.asarray(ref_f32),
                               rtol=5e-2, atol=5e-2)
    print("KERNEL_OK")
</pallas_src>

<mosaic_0001>
module attributes {stable_mosaic.version = 11 : i64} {
  func.func @_conv_in_lrelu_kernel(%arg0: i32, %arg1: i32, %arg2: memref<1x8x342xbf16, #tpu.memory_space<vmem>>, %arg3: memref<8x72xbf16, #tpu.memory_space<vmem>>, %arg4: memref<8x1xf32, #tpu.memory_space<vmem>>, %arg5: memref<8x1xf32, #tpu.memory_space<vmem>>, %arg6: memref<1x8x288xf32, #tpu.memory_space<vmem>>, %arg7: memref<72x288xbf16, #tpu.memory_space<vmem>>) attributes {dimension_semantics = [#tpu.dimension_semantics<parallel>, #tpu.dimension_semantics<arbitrary>], iteration_bounds = array<i64: 2, 1>, scalar_prefetch = 0 : i64, scratch_operands = 1 : i64, tpu.core_type = #tpu.core_type<tc>, window_params = [{transform_indices = @transform_0, window_bounds = array<i64: 1, 8, 342>}, {transform_indices = @transform_1, window_bounds = array<i64: 8, 72>}, {transform_indices = @transform_2, window_bounds = array<i64: 8, 1>}, {transform_indices = @transform_3, window_bounds = array<i64: 8, 1>}, {transform_indices = @transform_4, window_bounds = array<i64: 1, 8, 288>}]} {
    %c0_i32 = arith.constant 0 : i32
    %0 = arith.cmpi eq, %arg1, %c0_i32 : i32
    %1 = arith.extui %0 : i1 to i32
    %c0_i32_0 = arith.constant 0 : i32
    %2 = arith.cmpi ne, %1, %c0_i32_0 : i32
    scf.if %2 {
      %c0_23 = arith.constant 0 : index
      %c0_24 = arith.constant 0 : index
      %c0_25 = arith.constant 0 : index
      %56 = vector.load %arg2[%c0_23, %c0_24, %c0_25] : memref<1x8x342xbf16, #tpu.memory_space<vmem>>, vector<1x8x288xbf16>
      %57 = vector.shape_cast %56 : vector<1x8x288xbf16> to vector<8x288xbf16>
      %c0_26 = arith.constant 0 : index
      %c0_27 = arith.constant 0 : index
      %58 = vector.load %arg7[%c0_26, %c0_27] : memref<72x288xbf16, #tpu.memory_space<vmem>>, vector<8x288xbf16>
      tpu.vector_store %arg7[%c0_26, %c0_27], %57 {strides = array<i32>} : memref<72x288xbf16, #tpu.memory_space<vmem>>, vector<8x288xbf16>,
      %c0_28 = arith.constant 0 : index
      %c0_29 = arith.constant 0 : index
      %c1 = arith.constant 1 : index
      %59 = vector.load %arg2[%c0_28, %c0_29, %c1] : memref<1x8x342xbf16, #tpu.memory_space<vmem>>, vector<1x8x288xbf16>
      %60 = vector.shape_cast %59 : vector<1x8x288xbf16> to vector<8x288xbf16>
      %c8 = arith.constant 8 : index
      %c0_30 = arith.constant 0 : index
      %61 = vector.load %arg7[%c8, %c0_30] : memref<72x288xbf16, #tpu.memory_space<vmem>>, vector<8x288xbf16>
      tpu.vector_store %arg7[%c8, %c0_30], %60 {strides = array<i32>} : memref<72x288xbf16, #tpu.memory_space<vmem>>, vector<8x288xbf16>,
      %c0_31 = arith.constant 0 : index
      %c0_32 = arith.constant 0 : index
      %c2 = arith.constant 2 : index
      %62 = vector.load %arg2[%c0_31, %c0_32, %c2] : memref<1x8x342xbf16, #tpu.memory_space<vmem>>, vector<1x8x288xbf16>
      %63 = vector.shape_cast %62 : vector<1x8x288xbf16> to vector<8x288xbf16>
      %c16 = arith.constant 16 : index
      %c0_33 = arith.constant 0 : index
      %64 = vector.load %arg7[%c16, %c0_33] : memref<72x288xbf16, #tpu.memory_space<vmem>>, vector<8x288xbf16>
      tpu.vector_store %arg7[%c16, %c0_33], %63 {strides = array<i32>} : memref<72x288xbf16, #tpu.memory_space<vmem>>, vector<8x288xbf16>,
      %c0_34 = arith.constant 0 : index
      %c0_35 = arith.constant 0 : index
      %c18 = arith.constant 18 : index
      %65 = vector.load %arg2[%c0_34, %c0_35, %c18] : memref<1x8x342xbf16, #tpu.memory_space<vmem>>, vector<1x8x288xbf16>
      %66 = vector.shape_cast %65 : vector<1x8x288xbf16> to vector<8x288xbf16>
      %c24 = arith.constant 24 : index
      %c0_36 = arith.constant 0 : index
      %67 = vector.load %arg7[%c24, %c0_36] : memref<72x288xbf16, #tpu.memory_space<vmem>>, vector<8x288xbf16>
      tpu.vector_store %arg7[%c24, %c0_36], %66 {strides = array<i32>} : memref<72x288xbf16, #tpu.memory_space<vmem>>, vector<8x288xbf16>,
      %c0_37 = arith.constant 0 : index
      %c0_38 = arith.constant 0 : index
      %c19 = arith.constant 19 : index
      %68 = vector.load %arg2[%c0_37, %c0_38, %c19] : memref<1x8x342xbf16, #tpu.memory_space<vmem>>, vector<1x8x288xbf16>
      %69 = vector.shape_cast %68 : vector<1x8x288xbf16> to vector<8x288xbf16>
      %c32 = arith.constant 32 : index
      %c0_39 = arith.constant 0 : index
      %70 = vector.load %arg7[%c32, %c0_39] : memref<72x288xbf16, #tpu.memory_space<vmem>>, vector<8x288xbf16>
      tpu.vector_store %arg7[%c32, %c0_39], %69 {strides = array<i32>} : memref<72x288xbf16, #tpu.memory_space<vmem>>, vector<8x288xbf16>,
      %c0_40 = arith.constant 0 : index
      %c0_41 = arith.constant 0 : index
      %c20 = arith.constant 20 : index
      %71 = vector.load %arg2[%c0_40, %c0_41, %c20] : memref<1x8x342xbf16, #tpu.memory_space<vmem>>, vector<1x8x288xbf16>
      %72 = vector.shape_cast %71 : vector<1x8x288xbf16> to vector<8x288xbf16>
      %c40 = arith.constant 40 : index
      %c0_42 = arith.constant 0 : index
      %73 = vector.load %arg7[%c40, %c0_42] : memref<72x288xbf16, #tpu.memory_space<vmem>>, vector<8x288xbf16>
      tpu.vector_store %arg7[%c40, %c0_42], %72 {strides = array<i32>} : memref<72x288xbf16, #tpu.memory_space<vmem>>, vector<8x288xbf16>,
      %c0_43 = arith.constant 0 : index
      %c0_44 = arith.constant 0 : index
      %c36 = arith.constant 36 : index
      %74 = vector.load %arg2[%c0_43, %c0_44, %c36] : memref<1x8x342xbf16, #tpu.memory_space<vmem>>, vector<1x8x288xbf16>
      %75 = vector.shape_cast %74 : vector<1x8x288xbf16> to vector<8x288xbf16>
      %c48 = arith.constant 48 : index
      %c0_45 = arith.constant 0 : index
      %76 = vector.load %arg7[%c48, %c0_45] : memref<72x288xbf16, #tpu.memory_space<vmem>>, vector<8x288xbf16>
      tpu.vector_store %arg7[%c48, %c0_45], %75 {strides = array<i32>} : memref<72x288xbf16, #tpu.memory_space<vmem>>, vector<8x288xbf16>,
      %c0_46 = arith.constant 0 : index
      %c0_47 = arith.constant 0 : index
      %c37 = arith.constant 37 : index
      %77 = vector.load %arg2[%c0_46, %c0_47, %c37] : memref<1x8x342xbf16, #tpu.memory_space<vmem>>, vector<1x8x288xbf16>
      %78 = vector.shape_cast %77 : vector<1x8x288xbf16> to vector<8x288xbf16>
      %c56 = arith.constant 56 : index
      %c0_48 = arith.constant 0 : index
      %79 = vector.load %arg7[%c56, %c0_48] : memref<72x288xbf16, #tpu.memory_space<vmem>>, vector<8x288xbf16>
      tpu.vector_store %arg7[%c56, %c0_48], %78 {strides = array<i32>} : memref<72x288xbf16, #tpu.memory_space<vmem>>, vector<8x288xbf16>,
      %c0_49 = arith.constant 0 : index
      %c0_50 = arith.constant 0 : index
      %c38 = arith.constant 38 : index
      %80 = vector.load %arg2[%c0_49, %c0_50, %c38] : memref<1x8x342xbf16, #tpu.memory_space<vmem>>, vector<1x8x288xbf16>
      %81 = vector.shape_cast %80 : vector<1x8x288xbf16> to vector<8x288xbf16>
      %c64 = arith.constant 64 : index
      %c0_51 = arith.constant 0 : index
      %82 = vector.load %arg7[%c64, %c0_51] : memref<72x288xbf16, #tpu.memory_space<vmem>>, vector<8x288xbf16>
      tpu.vector_store %arg7[%c64, %c0_51], %81 {strides = array<i32>} : memref<72x288xbf16, #tpu.memory_space<vmem>>, vector<8x288xbf16>,
    } else {
    }
    %c0 = arith.constant 0 : index
    %c0_1 = arith.constant 0 : index
    %3 = vector.load %arg3[%c0, %c0_1] : memref<8x72xbf16, #tpu.memory_space<vmem>>, vector<8x72xbf16>
    %c0_2 = arith.constant 0 : index
    %c0_3 = arith.constant 0 : index
    %4 = vector.load %arg7[%c0_2, %c0_3] : memref<72x288xbf16, #tpu.memory_space<vmem>>, vector<72x288xbf16>
    %cst = arith.constant dense<0.000000e+00> : vector<8x288xf32>
    %5 = tpu.matmul %3, %4, %cst {dimension_numbers = #tpu.dot_dimension_numbers<[1], [0], [0], [1], [0, 0, 1, 1], [], []>} : vector<8x72xbf16>, vector<72x288xbf16>, vector<8x288xf32> -> vector<8x288xf32>
    %6 = tpu.iota {dimensions = array<i32: 1>} : vector<1x288xi32>
    %7 = arith.sitofp %6 : vector<1x288xi32> to vector<1x288xf32>
    %cst_4 = arith.constant 5.000000e-01 : f32
    %8 = vector.broadcast %cst_4 : f32 to vector<1x288xf32>
    %9 = arith.addf %7, %8 : vector<1x288xf32>
    %cst_5 = arith.constant 0.055555556 : f32
    %10 = vector.broadcast %cst_5 : f32 to vector<1x288xf32>
    %11 = arith.mulf %9, %10 : vector<1x288xf32>
    %12 = math.floor %11 : vector<1x288xf32>
    %cst_6 = arith.constant 1.800000e+01 : f32
    %13 = vector.broadcast %cst_6 : f32 to vector<1x288xf32>
    %14 = arith.mulf %12, %13 : vector<1x288xf32>
    %15 = arith.subf %7, %14 : vector<1x288xf32>
    %cst_7 = arith.constant 1.550000e+01 : f32
    %16 = vector.broadcast %cst_7 : f32 to vector<1x288xf32>
    %17 = arith.cmpf olt, %15, %16 : vector<1x288xf32>
    %18 = arith.extui %17 : vector<1x288xi1> to vector<1x288xi32>
    %19 = arith.sitofp %18 : vector<1x288xi32> to vector<1x288xf32>
    %20 = vector.broadcast %19 : vector<1x288xf32> to vector<8x288xf32>
    %21 = arith.mulf %5, %20 : vector<8x288xf32>
    %cst_8 = arith.constant dense<0.000000e+00> : vector<8xf32>
    %22 = vector.multi_reduction <add>, %21, %cst_8 [1] : vector<8x288xf32> to vector<8xf32>
    %23 = vector.shape_cast %22 : vector<8xf32> to vector<8x1xf32>
    %24 = arith.mulf %21, %5 : vector<8x288xf32>
    %cst_9 = arith.constant dense<0.000000e+00> : vector<8xf32>
    %25 = vector.multi_reduction <add>, %24, %cst_9 [1] : vector<8x288xf32> to vector<8xf32>
    %26 = vector.shape_cast %25 : vector<8xf32> to vector<8x1xf32>
    %cst_10 = arith.constant 3.906250e-03 : f32
    %27 = vector.broadcast %cst_10 : f32 to vector<8x1xf32>
    %28 = arith.mulf %23, %27 : vector<8x1xf32>
    %cst_11 = arith.constant 3.906250e-03 : f32
    %29 = vector.broadcast %cst_11 : f32 to vector<8x1xf32>
    %30 = arith.mulf %26, %29 : vector<8x1xf32>
    %31 = arith.mulf %28, %28 : vector<8x1xf32>
    %32 = arith.subf %30, %31 : vector<8x1xf32>
    %cst_12 = arith.constant 0.000000e+00 : f32
    %33 = vector.broadcast %cst_12 : f32 to vector<8x1xf32>
    %34 = arith.maximumf %32, %33 : vector<8x1xf32>
    %35 = vector.broadcast %28 : vector<8x1xf32> to vector<8x288xf32>
    %36 = arith.subf %5, %35 : vector<8x288xf32>
    %cst_13 = arith.constant 9.99999974E-6 : f32
    %37 = vector.broadcast %cst_13 : f32 to vector<8x1xf32>
    %38 = arith.addf %34, %37 : vector<8x1xf32>
    %39 = math.rsqrt %38 : vector<8x1xf32>
    %40 = vector.broadcast %39 : vector<8x1xf32> to vector<8x288xf32>
    %41 = arith.mulf %36, %40 : vector<8x288xf32>
    %c0_14 = arith.constant 0 : index
    %c0_15 = arith.constant 0 : index
    %42 = vector.load %arg4[%c0_14, %c0_15] : memref<8x1xf32, #tpu.memory_space<vmem>>, vector<8x1xf32>
    %43 = vector.broadcast %42 : vector<8x1xf32> to vector<8x288xf32>
    %44 = arith.mulf %41, %43 : vector<8x288xf32>
    %c0_16 = arith.constant 0 : index
    %c0_17 = arith.constant 0 : index
    %45 = vector.load %arg5[%c0_16, %c0_17] : memref<8x1xf32, #tpu.memory_space<vmem>>, vector<8x1xf32>
    %46 = vector.broadcast %45 : vector<8x1xf32> to vector<8x288xf32>
    %47 = arith.addf %44, %46 : vector<8x288xf32>
    %cst_18 = arith.constant 0.000000e+00 : f32
    %48 = vector.broadcast %cst_18 : f32 to vector<8x288xf32>
    %49 = arith.cmpf oge, %47, %48 : vector<8x288xf32>
    %cst_19 = arith.constant 0.00999999977 : f32
    %50 = vector.broadcast %cst_19 : f32 to vector<8x288xf32>
    %51 = arith.mulf %50, %47 : vector<8x288xf32>
    %52 = arith.select %49, %47, %51 : vector<8x288xi1>, vector<8x288xf32>
    %c0_20 = arith.constant 0 : index
    %c0_21 = arith.constant 0 : index
    %c0_22 = arith.constant 0 : index
    %53 = vector.load %arg6[%c0_20, %c0_21, %c0_22] : memref<1x8x288xf32, #tpu.memory_space<vmem>>, vector<1x8x288xf32>
    %54 = vector.shape_cast %53 : vector<1x8x288xf32> to vector<8x288xf32>
    %55 = vector.shape_cast %52 : vector<8x288xf32> to vector<1x8x288xf32>
    tpu.vector_store %arg6[%c0_20, %c0_21, %c0_22], %55 {strides = array<i32>} : memref<1x8x288xf32, #tpu.memory_space<vmem>>, vector<1x8x288xf32>,
    return
  }
  func.func @transform_0(%arg0: i32, %arg1: i32) -> (i32, i32, i32) {
    %c0_i32 = arith.constant 0 : i32
    %c0_i32_0 = arith.constant 0 : i32
    %c0_i32_1 = arith.constant 0 : i32
    return %arg0, %c0_i32, %c0_i32_0 : i32, i32, i32
  }
  func.func @transform_1(%arg0: i32, %arg1: i32) -> (i32, i32) {
    %c0_i32 = arith.constant 0 : i32
    %c0_i32_0 = arith.constant 0 : i32
    return %arg1, %c0_i32 : i32, i32
  }
  func.func @transform_2(%arg0: i32, %arg1: i32) -> (i32, i32) {
    %c0_i32 = arith.constant 0 : i32
    %c0_i32_0 = arith.constant 0 : i32
    return %arg1, %c0_i32 : i32, i32
  }
  func.func @transform_3(%arg0: i32, %arg1: i32) -> (i32, i32) {
    %c0_i32 = arith.constant 0 : i32
    %c0_i32_0 = arith.constant 0 : i32
    return %arg1, %c0_i32 : i32, i32
  }
  func.func @transform_4(%arg0: i32, %arg1: i32) -> (i32, i32, i32) {
    %c0_i32 = arith.constant 0 : i32
    %c0_i32_0 = arith.constant 0 : i32
    return %arg0, %arg1, %c0_i32 : i32, i32, i32
  }
}

</mosaic_0001>

<bundles_post_ra>
// kernel: tpu_custom_call.1
= control target key start
LH: loop header
LB: loop body
LE: loop exit
PB: predicated region body
PF: predicated region fallthrough
CT: control target
= control target key end

     0   :  { %9 = vsyncpa [#allocation4], 0  ;;  %s1300_s0 = inlined_call_operand.hbm [shape: bf16[2,8,342], index: 0, kind: input, shape index: {}]   ;;  %s1301_s1 = inlined_call_operand.vmem [shape: bf16[8,72], index: 1, kind: input, shape index: {}]   ;;  %s1302_s2 = inlined_call_operand.vmem [shape: f32[8,1], index: 2, kind: input, shape index: {}]   ;;  %s1303_s3 = inlined_call_operand.vmem [shape: f32[8,1], index: 3, kind: input, shape index: {}]   ;;  %s1304_s4 = inlined_call_operand.hbm [shape: f32[2,8,288], index: 4, kind: output, shape index: {}]  }
   0x1   :  { %11 = vsyncpa [#allocation4 + $0x1], 0 }
   0x2   :  { %12 = vsyncpa [#allocation5], 0 }
   0x3   :  { %14 = vsyncpa [#allocation5 + $0x1], 0  ;;  %s1124_s15 = smov 0   ;;  %s1126_s16 = smov 0  }
   0x4   :  { %s1128_s17 = smov 0   ;;  %s1130_s18 = smov 0  }
   0x5   :  { %s1132_s19 = smov 0   ;;  %s1134_s20 = smov 0  }
   0x6 LB: > { %s817_s21 = sadd.s32 4294967295, %s1087_s20   ;;  %s818_s22 = sadd.s32 4294967294, %s1087_s20   ;;  %s1087_s20 = sphi %s1134_s20, %s20_s20   ;;  %s1083_s19 = sphi %s1132_s19, %s1313_s19   ;;  %s1079_s18 = sphi %s1130_s18, %s1312_s18   ;;  %s1075_s17 = sphi %s1128_s17, %s1311_s17   ;;  %s1071_s16 = sphi %s1126_s16, %s1310_s16   ;;  %s1067_s15 = sphi %s1124_s15, %s1309_s15  }
   0x7   : > { %s32_s23 = sadd.s32 1, %s1083_s19  ;;  %s39_s24 = sadd.s32 1, %s1075_s17 }
   0x8   : > { %p34_p0 = scmp.ge.s32.totalorder %s32_s23, 2  ;;  %p46_p1 = scmp.ne.s32.totalorder %s1075_s17, %s1071_s16 }
   0x9   : > { %p47_p2 = scmp.eq.s32.totalorder %s1087_s20, 0  ;;  %p52_p3 = scmp.ne.s32.totalorder %s1071_s16, %s1067_s15 }
   0xa   : > { %s1315_s23 = smov (%p34_p0, %s32_s23), 0  ;;  %p53_p5 = scmp.eq.s32.totalorder %s817_s21, 0 }
   0xb   : > { %p1165_p4 = por %p47_p2, %p46_p1  ;;  %s36_s26 = ssub.s32 %s1083_s19, %s1315_s23 }
   0xc   : > { %p156_p6 = scmp.eq.s32.totalorder %s817_s21, 1  ;;  %p37_p7 = scmp.eq.s32.totalorder %s36_s26, 0 }
   0xd   : > { %p1171_p8 = por %p53_p5, %p52_p3  ;;  %p162_p10 = scmp.eq.s32.totalorder %s818_s22, 1 }
   0xe   : > { %p1175_p9 = por %p156_p6, %p46_p1  ;;  %p823_p12 = scmp.ge.s32.totalorder %s1087_s20, 2 }
   0xf   : > { %s1180_s29 = scalar_select %p37_p7, %s1075_s17, %s39_s24  }
  0x10   : > { %p1182_p11 = por %p162_p10, %p52_p3  ;;  %p912_p13 = scmp.lt.s32.totalorder %s1087_s20, 2 }
  0x11   : > { %s203_s5 = sand.u32 1, %s1075_s17   ;;  %s896_s7 = smul.u32 12, %s1083_s19 }
  0x12   : > { %s895_s6 = smul.u32 12, %s203_s5  ;;  %p905_p0 = pnand %p912_p13, %p1165_p4 }
  0x13   : > { %p825_p2 = scmp.ge.s32.totalorder %s1087_s20, 1  ;;  %s212_s10 = scalar_lea.hbm %s1300_s0, %s896_s7 }
  0x14   : > { %s207_s11 = scalar_lea.vmem [#allocation3], %s895_s6  ;;  %s214_s13 = sshll.u32 %s212_s10, 4  ;;  %s215_s13 = int_to_ptr.hbm [resolvable:$true] %s214_s13 }
  0x15   : > { %s216_s12 = sshll.u32 %s207_s11, 4  ;;  %s204_s14 = scalar_lea.sflag [#allocation4], %s203_s5  ;;  %s217_s12 = int_to_ptr.vmem [resolvable:$true] %s216_s12 }
  0x16   : > { %907 = dma.hbm_to_vmem [thread:$0]  (!%p905_p0), %s215_s13, 192, %s217_s12, %s204_s14  }
  0x17   : > { %p221_p1 = scmp.lt.s32.totalorder %s1087_s20, 3 }
  0x19   : > { %p222_p3 = pnand %p825_p2, %p221_p1 }
  0x1a   : > { %s1198_s21 = sand.u32 (!%p222_p3), 1, %s1071_s16  }
  0x1b   : > { %225 = sbr.rel (%p222_p3) target bundleno = 496 (0x1f0), region = 36  ;;  %s228_s24 = scalar_lea.sflag (!%p222_p3), [#allocation4], %s1198_s21 }
  0x1c   : > { %s897_s22 = smul.u32 (!%p222_p3), 12, %s1198_s21 }
  0x1e   : > { %s1202_s25 = scalar_lea.vmem (!%p222_p3), [#allocation3], %s897_s22 }
  0x20   : > { %1058 = dma.done.wait (%p1171_p8), %s228_s24, 192  }
  0x21   : > { %1060 = vsyncadd (%p1171_p8), %s228_s24, 4294967104  ;;  %v412_v0 = vld [vmem:[%s1202_s25 + $0x8] sm:$0xf]  ;;  %v411_v2 = vld [vmem:[%s1202_s25] sm:$0xff]  ;;  %s1089_s26 = smov 90   ;;  %s1090_s5 = smov 92  }
  0x22   : > { %v378_v1 = vld [vmem:[%s1202_s25 + $0x8] sm:$0xf]  ;;  %417 = vrot.lane.b32.xlu0 %v412_v0, %s1089_s26  ;;  %288 = vst [vmem:[#allocation2] sm:$0xff] %v411_v2  ;;  %381 = vrot.lane.b32.xlu2 %v411_v2, %s1090_s5  ;;  %s1091_s27 = smov 91   ;;  %s1092_s6 = smov 108   ;;  %vm289_vm0 = vcmask 257024  }
  0x23   : > { %383 = vrot.lane.b32.xlu1 %v378_v1, %s1090_s5  ;;  %v395_v3 = vld [vmem:[%s1202_s25 + $0x8] sm:$0xf]  ;;  %s1093_s7 = smov 109   ;;  %s1094_s8 = smov 126   ;;  %vm301_vm1 = vcmask 1043456   ;;  %vm388_vm2 = vcmask 752640  }
  0x24   : > { %v361_v4 = vld [vmem:[%s1202_s25 + $0x8] sm:$0xf]  ;;  %s1095_s9 = smov 110   ;;  %s1096_s10 = smov 127   ;;  %vm422_vm3 = vcmask 736256   ;;  %vm405_vm4 = vcmask 744448  }
  0x25   : > { %v344_v5 = vld [vmem:[%s1202_s25 + $0x8] sm:$0xf]  ;;  %vm354_vm5 = vcmask 891904   ;;  %vm371_vm6 = vcmask 883712   ;;  %vm337_vm7 = vcmask 900096   ;;  %vm320_vm8 = vcmask 1031168  }
  0x26   : > { %v310_v6 = vld [vmem:[%s1202_s25 + $0x8] sm:$0xf]  ;;  %vm519_vm9 = vcmask 588800   ;;  %vm303_vm10 = vcmask 1039360   ;;  %vm607_vm14 = vcmask 261120   ;;  %s1025_s14 = scalar_lea.hbm %s1304_s4, 48 }
  0x27   : > { %v327_v7 = vld [vmem:[%s1202_s25 + $0x8] sm:$0xf] }
  0x28   : > { %v292_v8 = vld [vmem:[%s1202_s25 + $0x8] sm:$0xf] }
  0x29   : > { %v287_v17 = vld [vmem:[%s1202_s25 + $0x8] sm:$0xf]  ;;  %s898_s25 = smul.u32 24, %s1198_s21 }
  0x2a   : > { %415 = vrot.lane.b32.xlu0 %v411_v2, %s1089_s26  ;;  %398 = vrot.lane.b32.xlu2 %v411_v2, %s1091_s27  ;;  %290 = vst.msk [vmem:[#allocation2 + $0x8] sm:$0xf] %vm289_vm0, %v287_v17  ;;  %s899_s26 = smul.u32 24, %s1079_s18 }
  0x2b   : > { %400 = vrot.lane.b32.xlu1 %v395_v3, %s1091_s27 }
  0x32   : > { %349 = vrot.lane.b32.xlu0 %v344_v5, %s1093_s7  ;;  %347 = vrot.lane.b32.xlu2 %v411_v2, %s1093_s7  ;;  %s268_s7 = scalar_lea.vmem [#allocation6], %s898_s25 }
  0x33   : > { %366 = vrot.lane.b32.xlu1 %v361_v4, %s1092_s6 }
  0x3a   : > { %364 = vrot.lane.b32.xlu0 %v411_v2, %s1092_s6  ;;  %332 = vrot.lane.b32.xlu2 %v327_v7, %s1095_s9  ;;  %s686_s6 = scalar_lea.hbm %s1304_s4, %s899_s26 }
  0x3b   : > { %315 = vrot.lane.b32.xlu1 %v310_v6, %s1094_s8  ;;  %v836_v6 = vld [vmem:[#allocation2 + $0x8] sm:$0xf]  ;;  %s690_s18 = sshll.u32 %s686_s6, 4  ;;  %s691_s18 = int_to_ptr.hbm [resolvable:$true] %s690_s18 }
  0x42   : > { %313 = vrot.lane.b32.xlu0 %v411_v2, %s1094_s8  ;;  %297 = vrot.lane.b32.xlu2 %v292_v8, %s1096_s10  ;;  %s688_s8 = sshll.u32 %s268_s7, 4  ;;  %s689_s8 = int_to_ptr.vmem [resolvable:$true] %s688_s8 }
  0x43   : > { %330 = vrot.lane.b32.xlu1 %v411_v2, %s1095_s9  ;;  %s673_s9 = scalar_lea.sflag [#allocation5], %s1198_s21 }
  0x4a   : > { %295 = vrot.lane.b32.xlu0 %v411_v2, %s1096_s10  ;;  %s1019_s10 = sshra.s32 %s691_s18, 4  ;;  %s1020_s10 = int_to_ptr.hbm [resolvable:$true] %s1019_s10 }
  0x4b   : > { %s1021_s11 = scalar_lea.hbm %s1020_s10, 24  ;;  %p1026_p7 = scmp.lt.s32.totalorder %s1020_s10, %s1304_s4 }
  0x4c   : > { %p1022_p4 = scmp.ne.s32.totalorder %s1020_s10, %s1021_s11  ;;  %p1027_p8 = scmp.lt.s32.totalorder %s1025_s14, %s1021_s11 }
  0x4e   : > { %p1023_p5 = pnand %p1022_p4, %p1175_p9  ;;  %p1028_p10 = por %p1027_p8, %p1026_p7 }
  0x50   : > { %p1024_p6 = pneg %p1023_p5 }
  0x52   : > { %p1029_p13 = pnand %p1028_p10, %p1024_p6 }
  0x7c   : > { %v382_v9 = vpop.permute.xlu2 %381 }
  0x7d   : > { %v385_v12 = vrot.slane %v382_v9, 4 }
  0x84   : > { %v399_v10 = vpop.permute.xlu2 %398 }
  0x85   : > { %v402_v20 = vrot.slane %v399_v10, 4 }
  0x8c   : > { %v348_v11 = vpop.permute.xlu2 %347 }
  0x8d   : > { %v351_v37 = vrot.slane %v348_v11, 4 }
  0x94   : > { %v418_v13 = vpop.permute.xlu0 %417  ;;  %v1218_v16 = vpop.permute.xlu2 %332 }
  0x95   : > { %v384_v14 = vpop.permute.xlu1 %383  ;;  %427 = vst.msk [vmem:[#allocation2 + $0x68] sm:$0xf] %vm289_vm0, %v418_v13  ;;  %v420_v24 = vrot.slane %v418_v13, 4  ;;  %v335_v2 = vrot.slane %v1218_v16, 4 }
  0x96   : > { %v386_v15 = vrot.slane %v384_v14, 4  ;;  %393 = vst.msk [vmem:[#allocation2 + $0x50] sm:$0xf] %vm289_vm0, %v384_v14 }
  0x97   : > { %342 = vst.msk [vmem:[#allocation2 + $0x2c] sm:$0xf] %vm289_vm0, %v1218_v16 }
  0x98   : > { %v387_v18 = vsel %vm301_vm1, %v385_v12, %v386_v15 }
  0x99   : > { %v389_v19 = vsel %vm388_vm2, %v382_v9, %v387_v18 }
  0x9a   : > { %392 = vst [vmem:[#allocation2 + $0x48] sm:$0xff] %v389_v19 }
  0x9c   : > { %v416_v21 = vpop.permute.xlu0 %415  ;;  %v446_v23 = vld [vmem:[#allocation2 + $0x68] sm:$0xf]  ;;  %v1227_v28 = vpop.permute.xlu2 %297 }
  0x9d   : > { %v401_v22 = vpop.permute.xlu1 %400  ;;  %v419_v25 = vrot.slane %v416_v21, 4  ;;  %v491_v27 = vunpack.c.l.b16 %v446_v23  ;;  %308 = vst.msk [vmem:[#allocation2 + $0x14] sm:$0xf] %vm289_vm0, %v1227_v28  ;;  %v872_v42 = vld [vmem:[#allocation2 + $0x50] sm:$0xf]  ;;  %v300_v23 = vrot.slane %v1227_v28, 4 }
  0x9e   : > { %v403_v26 = vrot.slane %v401_v22, 4  ;;  %410 = vst.msk [vmem:[#allocation2 + $0x5c] sm:$0xf] %vm289_vm0, %v401_v22  ;;  %v888_v1 = vld [vmem:[#allocation2 + $0x28] sm:$0xf0] }
  0x9f   : > { %v421_v29 = vsel %vm301_vm1, %v419_v25, %v420_v24  ;;  %v506_v31 = vpack.c.b16 %v491_v27, %v491_v27  ;;  %v428_v25 = vld [vmem:[%s1301_s1] sm:$0xf] }
  0xa0   : > { %v404_v30 = vsel %vm301_vm1, %v402_v20, %v403_v26  ;;  %v423_v32 = vsel %vm422_vm3, %v416_v21, %v421_v29 }
  0xa1   : > { %v406_v33 = vsel %vm405_vm4, %v399_v10, %v404_v30  ;;  %v531_v34 = vsel %vm301_vm1, %v506_v31, 0  ;;  %v489_v35 = vunpack.c.l.b16 %v423_v32  ;;  %v490_v36 = vunpack.c.h.b16 %v423_v32  ;;  %v864_v50 = vld [vmem:[#allocation2 + $0x48] sm:$0xf]  ;;  %v892_v51 = vld [vmem:[#allocation2 + $0x4c] sm:$0xf] }
  0xa2   : > { %409 = vst [vmem:[#allocation2 + $0x54] sm:$0xff] %v406_v33  ;;  %562 = vmatpush.bf16.msra.mxu2 %v531_v34 }
  0xa3   : > { %v504_v38 = vpack.c.b16 %v489_v35, %v489_v35  ;;  %v505_v39 = vpack.c.b16 %v490_v36, %v490_v36  ;;  %v828_v35 = vld [vmem:[#allocation2] sm:$0xf]  ;;  %v883_v36 = vld [vmem:[#allocation2 + $0x4] sm:$0xf] }
  0xa4   : > { %v350_v41 = vpop.permute.xlu0 %349 }
  0xa5   : > { %v367_v40 = vpop.permute.xlu1 %366  ;;  %v894_v43 = vld [vmem:[#allocation2 + $0x58] sm:$0xf0]  ;;  %v352_v44 = vrot.slane %v350_v41, 4  ;;  %v525_v46 = vsel %vm301_vm1, %v504_v38, 0  ;;  %359 = vst.msk [vmem:[#allocation2 + $0x38] sm:$0xf] %vm289_vm0, %v350_v41  ;;  %v572_v41 = vlaneseq }
  0xa6   : > { %376 = vst.msk [vmem:[#allocation2 + $0x44] sm:$0xf] %vm289_vm0, %v367_v40  ;;  %v873_v45 = vor.u32 %v894_v43, %v872_v42  ;;  %536 = vmatpush.bf16.msra.mxu0 %v525_v46  ;;  %v528_v47 = vsel %vm301_vm1, %v505_v39, 0  ;;  %v369_v59 = vrot.slane %v367_v40, 4 }
  0xa7   : > { %v353_v48 = vsel %vm301_vm1, %v351_v37, %v352_v44  ;;  %549 = vmatpush.bf16.msra.mxu1 %v528_v47  ;;  %v573_v42 = vand.u32 127, %v572_v41 }
  0xa8   : > { %563 = vmatpush.bf16.msra.mxu2 %v873_v45  ;;  %v355_v49 = vsel %vm354_vm5, %v348_v11, %v353_v48  ;;  %v885_v11 = vld [vmem:[#allocation2 + $0x10] sm:$0xf0] }
  0xa9   : > { %358 = vst [vmem:[#allocation2 + $0x30] sm:$0xff] %v355_v49  ;;  %v893_v52 = vld [vmem:[#allocation2 + $0x50] sm:$0xf0]  ;;  %v866_v53 = vld [vmem:[#allocation2 + $0x54] sm:$0xf0]  ;;  %v837_v20 = vor.u32 %v885_v11, %v836_v6  ;;  %v575_v43 = vadd.s32 256, %v573_v42  ;;  %v576_v46 = vcvt.s32.f32 %v573_v42 }
  0xaa   : > { %v865_v54 = vor.u32 %v893_v52, %v864_v50  ;;  %v869_v55 = vor.u32 %v892_v51, %v866_v53  ;;  %v574_v44 = vadd.s32 128, %v573_v42  ;;  %v642_v52 = vld [vmem:[%s1302_s2] sm:$0xff]  ;;  %v1097_v53 = vmov 0  }
  0xab   : > { %v578_v45 = vcvt.s32.f32 %v575_v43  ;;  %v579_v49 = vadd.f32 0.5, %v576_v46  ;;  %972 = vset.pattern.permute.xlu0 %v1097_v53 }
  0xac   : > { %v365_v56 = vpop.permute.xlu0 %364  ;;  %537 = vmatpush.bf16.msra.mxu0 %v865_v54  ;;  %550 = vmatpush.bf16.msra.mxu1 %v869_v55  ;;  %v860_v61 = vld [vmem:[#allocation2 + $0x38] sm:$0xf]  ;;  %v577_v47 = vcvt.s32.f32 %v574_v44 }
  0xad   : > { %v316_v57 = vpop.permute.xlu1 %315  ;;  %v891_v58 = vld [vmem:[#allocation2 + $0x40] sm:$0xf0]  ;;  %v368_v60 = vrot.slane %v365_v56, 4  ;;  %v581_v48 = vadd.f32 0.5, %v578_v45  ;;  %v582_v54 = vmul.f32 0.055555556, %v579_v49  ;;  %645 = vperm.xlu0 %972, %v642_v52  }
  0xae   : > { %325 = vst.msk [vmem:[#allocation2 + $0x20] sm:$0xf] %vm289_vm0, %v316_v57  ;;  %v861_v62 = vor.u32 %v891_v58, %v860_v61  ;;  %v318_v7 = vrot.slane %v316_v57, 4  ;;  %v580_v50 = vadd.f32 0.5, %v577_v47 }
  0xaf   : > { %v370_v63 = vsel %vm301_vm1, %v368_v60, %v369_v59  ;;  %v584_v51 = vmul.f32 0.055555556, %v581_v48  ;;  %v585_v57 = vfloor.f32 %v582_v54  ;;  %v651_v60 = vld [vmem:[%s1303_s3] sm:$0xff] }
  0xb0   : > { %v372_v0 = vsel %vm371_vm6, %v365_v56, %v370_v63  ;;  %564 = vmatpush.bf16.msra.mxu2 %v861_v62  ;;  %v852_v14 = vld [vmem:[#allocation2 + $0x30] sm:$0xf]  ;;  %v889_v18 = vld [vmem:[#allocation2 + $0x34] sm:$0xf]  ;;  %v583_v55 = vmul.f32 0.055555556, %v580_v50 }
  0xb1   : > { %375 = vst [vmem:[#allocation2 + $0x3c] sm:$0xff] %v372_v0  ;;  %v587_v56 = vfloor.f32 %v584_v51  ;;  %v588_v61 = vmul.f32 18.0, %v585_v57 }
  0xb2   : > { %v586_v58 = vfloor.f32 %v583_v55 }
  0xb3   : > { %v590_v59 = vmul.f32 18.0, %v587_v56 }
  0xb4   : > { %v314_v4 = vpop.permute.xlu0 %313  ;;  %v589_v62 = vmul.f32 18.0, %v586_v58 }
  0xb5   : > { %v331_v3 = vpop.permute.xlu1 %330  ;;  %v848_v5 = vld [vmem:[#allocation2 + $0x20] sm:$0xf]  ;;  %v317_v9 = vrot.slane %v314_v4, 4  ;;  %654 = vperm.xlu0 %972, %v651_v60   ;;  %v593_v63 = vsub.f32 %v578_v45, %v590_v59 }
  0xb6   : > { %v334_v8 = vrot.slane %v331_v3, 4  ;;  %v849_v10 = vor.u32 %v888_v1, %v848_v5  ;;  %v591_v1 = vsub.f32 %v576_v46, %v588_v61 }
  0xb7   : > { %v319_v13 = vsel %vm301_vm1, %v317_v9, %v318_v7  ;;  %vm596_vm11 = vcmp.lt.f32.partialorder %v593_v63, 15.5 }
  0xb8   : > { %v336_v12 = vsel %vm301_vm1, %v334_v8, %v335_v2  ;;  %565 = vmatpush.bf16.msra.mxu2 %v849_v10  ;;  %v321_v17 = vsel %vm320_vm8, %v314_v4, %v319_v13  ;;  %v890_v16 = vld [vmem:[#allocation2 + $0x38] sm:$0xf0]  ;;  %v854_v19 = vld [vmem:[#allocation2 + $0x3c] sm:$0xf0]  ;;  %v592_v2 = vsub.f32 %v577_v47, %v589_v62  ;;  %vm594_vm12 = vcmp.lt.f32.partialorder %v591_v1, 15.5 }
  0xb9   : > { %v338_v15 = vsel %vm337_vm7, %v331_v3, %v336_v12  ;;  %v853_v21 = vor.u32 %v890_v16, %v852_v14  ;;  %v857_v22 = vor.u32 %v889_v18, %v854_v19  ;;  %324 = vst [vmem:[#allocation2 + $0x18] sm:$0xff] %v321_v17  ;;  %v1098_v3 = vmov 0.0  }
  0xba   : > { %341 = vst [vmem:[#allocation2 + $0x24] sm:$0xff] %v338_v15  ;;  %v879_v4 = vsel %vm596_vm11, 1.0, %v1098_v3  ;;  %vm595_vm13 = vcmp.lt.f32.partialorder %v592_v2, 15.5  ;;  %v877_v6 = vsel %vm594_vm12, 1.0, %v1098_v3 }
  0xbb   : > { %538 = vmatpush.bf16.msra.mxu0 %v853_v21  ;;  %551 = vmatpush.bf16.msra.mxu1 %v857_v22  ;;  %v878_v7 = vsel %vm595_vm13, 1.0, %v1098_v3 }
  0xbc   : > { %v296_v24 = vpop.permute.xlu0 %295  ;;  %566 = vmatpush.bf16.msra.mxu2 %v837_v20 }
  0xbd   : > { %v299_v26 = vrot.slane %v296_v24, 4 }
  0xbf   : > { %v302_v27 = vsel %vm301_vm1, %v299_v26, %v300_v23  ;;  %876 = vmatmul.msk.bf16.vlgmr.msra.gmra.mxu2 %vm519_vm9, %v428_v25 }
  0xc0   : > { %v304_v29 = vsel %vm303_vm10, %v296_v24, %v302_v27  ;;  %v840_v28 = vld [vmem:[#allocation2 + $0x18] sm:$0xf]  ;;  %v886_v32 = vld [vmem:[#allocation2 + $0x1c] sm:$0xf] }
  0xc1   : > { %v887_v30 = vld [vmem:[#allocation2 + $0x20] sm:$0xf0]  ;;  %v842_v31 = vld [vmem:[#allocation2 + $0x24] sm:$0xf0]  ;;  %307 = vst [vmem:[#allocation2 + $0xc] sm:$0xff] %v304_v29 }
  0xc2   : > { %v841_v33 = vor.u32 %v887_v30, %v840_v28  ;;  %v845_v34 = vor.u32 %v886_v32, %v842_v31 }
  0xc4   : > { %539 = vmatpush.bf16.msra.mxu0 %v841_v33  ;;  %552 = vmatpush.bf16.msra.mxu1 %v845_v34 }
  0xc8   : > { %v884_v37 = vld [vmem:[#allocation2 + $0x8] sm:$0xf0]  ;;  %v830_v38 = vld [vmem:[#allocation2 + $0xc] sm:$0xf0] }
  0xc9   : > { %v829_v39 = vor.u32 %v884_v37, %v828_v35  ;;  %v833_v40 = vor.u32 %v883_v36, %v830_v38 }
  0xcb   : > { %540 = vmatpush.bf16.msra.mxu0 %v829_v39  ;;  %553 = vmatpush.bf16.msra.mxu1 %v833_v40 }
  0xce   : > { %874 = vmatmul.msk.bf16.vlgmr.msra.gmra.mxu0 %vm519_vm9, %v428_v25  ;;  %875 = vmatmul.msk.bf16.vlgmr.msra.gmra.mxu1 %vm519_vm9, %v428_v25 }
 0x11f   : > { %v646_v36 = vpop.permute.xlu0 %645 }
 0x127   : > { %v655_v49 = vpop.permute.xlu0 %654 }
 0x142   : > { %v568_v0 = vpop.f32.mrf.mxu2 }
 0x143   : > { %v605_v5 = vmul.f32 %v879_v4, %v568_v0 }
 0x145   : > { %v614_v13 = vmul.f32 %v605_v5, %v568_v0  ;;  %v608_v14 = vsel %vm607_vm14, %v605_v5, 0.0 }
 0x147   : > { %v616_v20 = vsel %vm607_vm14, %v614_v13, 0.0 }
 0x14a   : > { %v570_v8 = vpop.f32.mrf.mxu2 }
 0x14b   : > { %v542_v9 = vpop.f32.mrf.mxu0  ;;  %v555_v10 = vpop.f32.mrf.mxu1 }
 0x14c   : > { %v603_v11 = vmul.f32 %v877_v6, %v542_v9  ;;  %v604_v12 = vmul.f32 %v878_v7, %v555_v10 }
 0x14e   : > { %v612_v15 = vmul.f32 %v603_v11, %v542_v9  ;;  %v613_v17 = vmul.f32 %v604_v12, %v555_v10  ;;  %v606_v16 = vadd.f32 %v604_v12, %v603_v11 }
 0x150   : > { %v609_v18 = vadd.f32 %v608_v14, %v606_v16  ;;  %v615_v19 = vadd.f32 %v613_v17, %v612_v15 }
 0x152   : > { %610 = vadd.xlane.f32.xlu1 %v609_v18  ;;  %v617_v21 = vadd.f32 %v616_v20, %v615_v19 }
 0x153   : > { %v544_v22 = vpop.f32.mrf.mxu0  ;;  %v557_v23 = vpop.f32.mrf.mxu1 }
 0x154   : > { %618 = vadd.xlane.f32.xlu2 %v617_v21 }
 0x1c5   : > { %v611_v24 = vpop.xlane.xlu1 %610 }
 0x1c6   : > { %v620_v25 = vmul.f32 0.00390625, %v611_v24 }
 0x1c7   : > { %v619_v26 = vpop.xlane.xlu2 %618 }
 0x1c8   : > { %v621_v27 = vmul.f32 0.00390625, %v619_v26  ;;  %v622_v29 = vmul.f32 %v620_v25, %v620_v25  ;;  %v625_v39 = vsub.f32 %v542_v9, %v620_v25  ;;  %v626_v40 = vsub.f32 %v555_v10, %v620_v25 }
 0x1c9   : > { %v627_v41 = vsub.f32 %v568_v0, %v620_v25 }
 0x1ca   : > { %v623_v30 = vsub.f32 %v621_v27, %v622_v29 }
 0x1cc   : > { %v624_v31 = vmax.f32 %v623_v30, 0.0 }
 0x1ce   : > { %v628_v28 = vadd.f32 1e-05, %v624_v31 }
 0x1d0   : > { %973 = vrsqrt.f32 %v628_v28  ;;  %vm635_vm0 = vweird.f32 %v628_v28 }
 0x1d6   : > { %v974_v32 = vpop.eup %973 }
 0x1d7   : > { %v630_v33 = vmul.f32 %v974_v32, %v628_v28  ;;  %vm636_vm15 = vweird.f32 %v974_v32 }
 0x1d8   : > { %vm637_vm1 = vmor %vm635_vm0, %vm636_vm15 }
 0x1d9   : > { %v631_v34 = vmul.f32 %v974_v32, %v630_v33 }
 0x1db   : > { %v632_v35 = vmul.f32 0.5, %v631_v34 }
 0x1dd   : > { %v633_v37 = vsub.f32 1.5, %v632_v35 }
 0x1df   : > { %v634_v38 = vmul.f32 %v974_v32, %v633_v37 }
 0x1e1   : > { %v638_v42 = vsel %vm637_vm1, %v974_v32, %v634_v38 }
 0x1e2   : > { %v639_v43 = vmul.f32 %v638_v42, %v625_v39  ;;  %v640_v44 = vmul.f32 %v638_v42, %v626_v40  ;;  %v641_v45 = vmul.f32 %v638_v42, %v627_v41 }
 0x1e4   : > { %v648_v46 = vmul.f32 %v646_v36, %v639_v43  ;;  %v649_v47 = vmul.f32 %v646_v36, %v640_v44  ;;  %v650_v48 = vmul.f32 %v646_v36, %v641_v45 }
 0x1e6   : > { %v657_v50 = vadd.f32 %v655_v49, %v648_v46  ;;  %v658_v51 = vadd.f32 %v655_v49, %v649_v47  ;;  %v659_v52 = vadd.f32 %v655_v49, %v650_v48 }
 0x1e8   : > { %vm660_vm2 = vcmp.ge.f32.partialorder %v657_v50, 0.0  ;;  %vm661_vm3 = vcmp.ge.f32.partialorder %v658_v51, 0.0  ;;  %vm662_vm4 = vcmp.ge.f32.partialorder %v659_v52, 0.0  ;;  %v663_v53 = vmul.f32 0.01, %v657_v50 }
 0x1e9   : > { %v664_v54 = vmul.f32 0.01, %v658_v51  ;;  %v665_v55 = vmul.f32 0.01, %v659_v52 }
 0x1ea   : > { %v666_v56 = vsel %vm660_vm2, %v657_v50, %v663_v53 }
 0x1eb   : > { %v667_v57 = vsel %vm661_vm3, %v658_v51, %v664_v54  ;;  %v668_v58 = vsel %vm662_vm4, %v659_v52, %v665_v55  ;;  %669 = vst [vmem:[%s268_s7] sm:$0xff] %v666_v56 }
 0x1ec   : > { %670 = vst [vmem:[%s268_s7 + $0x8] sm:$0xff] %v667_v57 }
 0x1ed   : > { %671 = vst.msk [vmem:[%s268_s7 + $0x10] sm:$0xff] %vm607_vm14, %v668_v58 }
 0x1ee   : > { %1032 = shalt.err (!%p1029_p13)
}
 0x1ef   : > { %902 = dma.vmem_to_hbm [thread:$0]  (%p1175_p9), %s689_s8, 384, %s691_s18, %s673_s9  }
 0x1f0 PF: > { %s702_s21 = sand.u32 1, %s1067_s15   ;;  %p909_p0 = pnand %p823_p12, %p1182_p11 }
 0x1f1   : > { %s703_s25 = scalar_lea.sflag [#allocation5], %s702_s21 }
 0x1f2   : > { %p910_p2 = pneg %p909_p0 }
 0x1f4   : > { %1062 = dma.done.wait (%p910_p2), %s703_s25, 384  }
 0x1f5   : > { %1064 = vsyncadd (%p910_p2), %s703_s25, 4294966912  ;;  %s20_s20 = sadd.s32 1, %s1087_s20   ;;  %s1309_s15 = smov %s1071_s16 }
 0x1f6   : > { %p17_p1 = scmp.ge.s32.totalorder %s20_s20, 4   ;;  %s1310_s16 = smov %s1075_s17 }
 0x1f7   : > { %s1311_s17 = smov %s1180_s29  ;;  %s1312_s18 = smov %s1083_s19 }
 0x1f8   : > { %s1313_s19 = smov %s1315_s23  ;;  %19 = sbr.rel (!%p17_p1) target bundleno = 6 (0x6), region = 94 }
 0x1fd   :  { %709 = vsyncpa [#allocation4], 1 }
 0x1fe   :  { %711 = vsyncpa [#allocation4 + $0x1], 1 }
 0x1ff   :  { %712 = vsyncpa [#allocation5], 1 }
 0x200   :  { %714 = vsyncpa [#allocation5 + $0x1], 1 }

</bundles_post_ra>
